<compile_context>
chip_gen: v7x
topology: tpu7x:2x2x1
jax: 0.10.0
libtpu: 0.0.40
codegen_flags: <defaults>
</compile_context>

<pallas_src>
import functools

import jax
import jax.numpy as jnp
from jax.experimental import pallas as pl
from jax.experimental.pallas import tpu as pltpu

_LANE = 128      # vreg lane width      (last dim alignment)
_SUBLANE = 8     # vreg sublane width   (second-to-last dim alignment)


def _round_up(x, m):
    return ((x + m - 1) // m) * m


def _fused_ae_kernel(x_ref, *rest, num_layers, num_enc, acts, dcode_pad):
    """One batch tile through every Linear+activation layer (fully fused).

    x_ref:          (TB, D0)                 activation tile (f32, true width)
    rest[:L]:       (din_pad_l, dout_pad_l)  padded weights, already mxu dtype
    rest[L]:        (L, Dmax_pad)            packed, zero-padded biases (f32)
    rest[L+1]:      (TB, Dcode_pad+Ddec_pad) fused output slab (f32)
    """
    w_refs = rest[:num_layers]
    b_ref = rest[num_layers]
    out_ref = rest[num_layers + 1]

    mxu_dtype = w_refs[0].dtype
    h = x_ref[...].astype(jnp.float32)
    for l in range(num_layers):
        w = w_refs[l][...]                          # pre-cast; no per-step cast
        dout_pad = w.shape[1]
        b = b_ref[l:l + 1, :dout_pad]               # (1, dout_pad) static slice
        y = jnp.dot(h.astype(mxu_dtype), w,
                    preferred_element_type=jnp.float32)
        y = y + b                                   # elementwise math stays f32
        if acts[l] == "relu":
            h = jnp.maximum(y, 0.0)
        elif acts[l] == "sigmoid":
            h = jax.nn.sigmoid(y)
        else:
            raise ValueError(f"unknown activation {acts[l]}")
        if l == num_enc - 1:
            # 128-aligned, 128-wide store into the fused slab -> unmasked vst.
            out_ref[:, :dcode_pad] = h.astype(out_ref.dtype)
    out_ref[:, dcode_pad:] = h.astype(out_ref.dtype)


def autoencoder_forward(x, enc_params, dec_params, *, batch_tile=None,
                        mxu_dtype=jnp.bfloat16):
    """Matches AutoEncoder.forward: returns (output_encoder, output_decoder).

    x:            (B, dims[0]) float
    enc_params:   list of (w, b), w stored as (in_features, out_features)
    dec_params:   list of (w, b), last layer uses sigmoid
    batch_tile:   rows per grid step (None -> auto policy)
    mxu_dtype:    jnp.bfloat16 (MXU-native, default) or jnp.float32 (exact)
    """
    params = list(enc_params) + list(dec_params)
    num_layers = len(params)
    num_enc = len(enc_params)
    acts = tuple(["relu"] * (num_layers - 1) + ["sigmoid"])

    B, D0 = x.shape
    # Layer-0 keeps the true feature width (block = full last dim, legal);
    # every later width is lane-padded to 128 so activations stay lane-dense.
    din_pads = [D0] + [_round_up(params[l][0].shape[0], _LANE)
                       for l in range(1, num_layers)]
    dout_pads = [_round_up(w.shape[1], _LANE) for (w, _) in params]
    Dcode = params[num_enc - 1][0].shape[1]
    Dcode_pad = dout_pads[num_enc - 1]
    Ddec = params[-1][0].shape[1]
    Ddec_pad = dout_pads[-1]
    Dmax_pad = max(dout_pads)
    Dout_pad = Dcode_pad + Ddec_pad

    # Batch tiling policy: one tile for small/medium B, 512-row (128-multiple)
    # tiles for large B (pipelined + shardable across v7x's 2 TensorCores).
    if batch_tile is not None:
        TB = _round_up(batch_tile, _SUBLANE)
    elif B <= 512:
        TB = _round_up(B, _SUBLANE)
    else:
        TB = 512
    B_pad = _round_up(B, TB)
    num_tiles = B_pad // TB

    # Input: no feature-dim zero-pad copy; pad batch axis only if ragged.
    x_f32 = x.astype(jnp.float32)
    x_in = x_f32 if B_pad == B else jnp.pad(x_f32, ((0, B_pad - B), (0, 0)))

    # Pre-pad AND pre-cast weights to the MXU dtype once; biases stay f32.
    w_pads = []
    b_packed = jnp.zeros((num_layers, Dmax_pad), jnp.float32)
    for l, (w, b) in enumerate(params):
        din, dout = w.shape
        wp = jnp.zeros((din_pads[l], dout_pads[l]), mxu_dtype)
        wp = wp.at[:din, :dout].set(w.astype(mxu_dtype))
        w_pads.append(wp)
        b_packed = b_packed.at[l, :dout].set(b.astype(jnp.float32))

    kernel = functools.partial(
        _fused_ae_kernel, num_layers=num_layers, num_enc=num_enc,
        acts=acts, dcode_pad=Dcode_pad)

    in_specs = [pl.BlockSpec((TB, D0), lambda i: (i, 0))]
    for l in range(num_layers):
        # Constant index_map -> weight block fetched once, stays in VMEM.
        in_specs.append(
            pl.BlockSpec((din_pads[l], dout_pads[l]), lambda i: (0, 0)))
    in_specs.append(pl.BlockSpec((num_layers, Dmax_pad), lambda i: (0, 0)))

    out_specs = pl.BlockSpec((TB, Dout_pad), lambda i: (i, 0))
    out_shape = jax.ShapeDtypeStruct((B_pad, Dout_pad), jnp.float32)

    # Advisory cost estimate for XLA's scheduler.
    mxu_isz = jnp.dtype(mxu_dtype).itemsize
    w_bytes = sum(din_pads[l] * dout_pads[l] for l in range(num_layers)) * mxu_isz
    b_bytes = num_layers * Dmax_pad * 4
    cost = pl.CostEstimate(
        flops=2 * B_pad * sum(w.shape[0] * w.shape[1] for (w, _) in params),
        transcendentals=B_pad * Ddec,                      # final sigmoid exp
        bytes_accessed=B_pad * D0 * 4 + w_bytes + b_bytes + B_pad * Dout_pad * 4)

    # VMEM budget: only raise the scoped limit when a scaled-up config needs it
    # (v5e default scoped limit is 16 MiB; v7x physical VMEM is 64 MiB).
    vmem_est = (2 * w_bytes + 2 * b_bytes
                + 2 * TB * D0 * 4 + 2 * TB * Dout_pad * 4
                + 4 * TB * max(D0, Dmax_pad) * 4)
    cp_kwargs = {}
    if vmem_est > 12 * 1024 * 1024:
        cp_kwargs["vmem_limit_bytes"] = int(min(vmem_est * 3 // 2,
                                                64 * 1024 * 1024))

    out_pad = pl.pallas_call(
        kernel,
        out_shape=out_shape,
        grid=(num_tiles,),
        in_specs=in_specs,
        out_specs=out_specs,
        compiler_params=pltpu.CompilerParams(
            dimension_semantics=("parallel",), **cp_kwargs),
        cost_estimate=cost,
    )(x_in, *w_pads, b_packed)

    out_enc = out_pad[:B, :Dcode]
    out_dec = out_pad[:B, Dcode_pad:Dcode_pad + Ddec]
    return out_enc, out_dec


def init_autoencoder_params(key, dims_layers):
    """Deterministic synthetic parameters with the same shapes as the torch module.

    Returns (encoder_params, decoder_params), each a list of (w, b) with
    w stored as (in_features, out_features).
    """
    enc, dec = [], []
    # encoder: Linear(dims[i-1], dims[i]) for i = 1..len-1
    for i in range(1, len(dims_layers)):
        key, kw, kb = jax.random.split(key, 3)
        din, dout = dims_layers[i - 1], dims_layers[i]
        scale = 1.0 / jnp.sqrt(jnp.float32(din))
        w = jax.random.uniform(kw, (din, dout), jnp.float32, -scale, scale)
        b = jax.random.uniform(kb, (dout,), jnp.float32, -scale, scale)
        enc.append((w, b))
    # decoder: Linear(dims[i+1], dims[i]) for i = size-1..1, then Linear(dims[1], dims[0])
    size = len(dims_layers) - 1
    for i in range(size - 1, 0, -1):
        key, kw, kb = jax.random.split(key, 3)
        din, dout = dims_layers[i + 1], dims_layers[i]
        scale = 1.0 / jnp.sqrt(jnp.float32(din))
        w = jax.random.uniform(kw, (din, dout), jnp.float32, -scale, scale)
        b = jax.random.uniform(kb, (dout,), jnp.float32, -scale, scale)
        dec.append((w, b))
    key, kw, kb = jax.random.split(key, 3)
    din, dout = dims_layers[1], dims_layers[0]
    scale = 1.0 / jnp.sqrt(jnp.float32(din))
    w = jax.random.uniform(kw, (din, dout), jnp.float32, -scale, scale)
    b = jax.random.uniform(kb, (dout,), jnp.float32, -scale, scale)
    dec.append((w, b))
    return enc, dec


if __name__ == "__main__":
    # TODO(synk): dropout=True training path (nn.Dropout(0.25)) not implemented;
    # this reproduces the eval / dropout=False forward exactly.
    dims_layers = [64, 32, 16]   # input dim 64, hidden 32, code 16
    batch = 64

    key = jax.random.PRNGKey(0)
    key, kx = jax.random.split(key)
    x = jax.random.normal(kx, (batch, dims_layers[0]), jnp.float32)

    enc_params, dec_params = init_autoencoder_params(key, dims_layers)

    # pure-JAX reference
    def ref_forward(x, enc, dec):
        h = x
        for w, b in enc:
            h = jnp.maximum(h @ w + b, 0.0)
        e = h
        for w, b in dec[:-1]:
            h = jnp.maximum(h @ w + b, 0.0)
        w, b = dec[-1]
        d = jax.nn.sigmoid(h @ w + b)
        return e, d

    ref_enc, ref_dec = ref_forward(x, enc_params, dec_params)

    # Exact path (f32 MXU operands) — validates forward semantics tightly.
    fwd_f32 = jax.jit(functools.partial(autoencoder_forward,
                                        mxu_dtype=jnp.float32))
    out_enc, out_dec = fwd_f32(x, enc_params, dec_params)
    jax.block_until_ready((out_enc, out_dec))
    assert out_enc.shape == (batch, dims_layers[-1])
    assert out_dec.shape == (batch, dims_layers[0])
    assert jnp.allclose(out_enc, ref_enc, atol=1e-4, rtol=1e-4)
    assert jnp.allclose(out_dec, ref_dec, atol=1e-4, rtol=1e-4)

    # Default fast path (bf16 MXU operands, f32 accumulation).
    fwd_bf16 = jax.jit(autoencoder_forward)
    out_enc16, out_dec16 = fwd_bf16(x, enc_params, dec_params)
    jax.block_until_ready((out_enc16, out_dec16))
    assert jnp.allclose(out_enc16, ref_enc, atol=5e-2, rtol=5e-2)
    assert jnp.allclose(out_dec16, ref_dec, atol=5e-2, rtol=5e-2)

    print("KERNEL_OK")
</pallas_src>

<mosaic_0001>
module attributes {stable_mosaic.version = 11 : i64} {
  func.func @_fused_ae_kernel(%arg0: i32, %arg1: memref<64x64xf32, #tpu.memory_space<vmem>>, %arg2: memref<64x128xf32, #tpu.memory_space<vmem>>, %arg3: memref<128x128xf32, #tpu.memory_space<vmem>>, %arg4: memref<128x128xf32, #tpu.memory_space<vmem>>, %arg5: memref<128x128xf32, #tpu.memory_space<vmem>>, %arg6: memref<4x128xf32, #tpu.memory_space<vmem>>, %arg7: memref<64x256xf32, #tpu.memory_space<vmem>>) attributes {dimension_semantics = [#tpu.dimension_semantics<parallel>], iteration_bounds = array<i64: 1>, scalar_prefetch = 0 : i64, scratch_operands = 0 : i64, tpu.core_type = #tpu.core_type<tc>, window_params = [{transform_indices = @transform_0, window_bounds = array<i64: 64, 64>}, {pipeline_mode = #tpu.pipeline_mode<synchronous>, transform_indices = @transform_1, window_bounds = array<i64: 64, 128>}, {pipeline_mode = #tpu.pipeline_mode<synchronous>, transform_indices = @transform_2, window_bounds = array<i64: 128, 128>}, {pipeline_mode = #tpu.pipeline_mode<synchronous>, transform_indices = @transform_3, window_bounds = array<i64: 128, 128>}, {pipeline_mode = #tpu.pipeline_mode<synchronous>, transform_indices = @transform_4, window_bounds = array<i64: 128, 128>}, {pipeline_mode = #tpu.pipeline_mode<synchronous>, transform_indices = @transform_5, window_bounds = array<i64: 4, 128>}, {transform_indices = @transform_6, window_bounds = array<i64: 64, 256>}]} {
    %c0 = arith.constant 0 : index
    %c0_0 = arith.constant 0 : index
    %0 = vector.load %arg1[%c0, %c0_0] : memref<64x64xf32, #tpu.memory_space<vmem>>, vector<64x64xf32>
    %c0_1 = arith.constant 0 : index
    %c0_2 = arith.constant 0 : index
    %1 = vector.load %arg2[%c0_1, %c0_2] : memref<64x128xf32, #tpu.memory_space<vmem>>, vector<64x128xf32>
    %c0_3 = arith.constant 0 : index
    %c0_4 = arith.constant 0 : index
    %2 = vector.load %arg6[%c0_3, %c0_4] : memref<4x128xf32, #tpu.memory_space<vmem>>, vector<1x128xf32>
    %cst = arith.constant dense<0.000000e+00> : vector<64x128xf32>
    %3 = tpu.matmul %0, %1, %cst {dimension_numbers = #tpu.dot_dimension_numbers<[1], [0], [0], [1], [0, 0, 1, 1], [], []>} : vector<64x64xf32>, vector<64x128xf32>, vector<64x128xf32> -> vector<64x128xf32>
    %4 = vector.broadcast %2 : vector<1x128xf32> to vector<64x128xf32>
    %5 = arith.addf %3, %4 : vector<64x128xf32>
    %cst_5 = arith.constant 0.000000e+00 : f32
    %6 = vector.broadcast %cst_5 : f32 to vector<64x128xf32>
    %7 = arith.maximumf %5, %6 : vector<64x128xf32>
    %c0_6 = arith.constant 0 : index
    %c0_7 = arith.constant 0 : index
    %8 = vector.load %arg3[%c0_6, %c0_7] : memref<128x128xf32, #tpu.memory_space<vmem>>, vector<128x128xf32>
    %c1 = arith.constant 1 : index
    %c0_8 = arith.constant 0 : index
    %9 = vector.load %arg6[%c1, %c0_8] : memref<4x128xf32, #tpu.memory_space<vmem>>, vector<1x128xf32>
    %cst_9 = arith.constant dense<0.000000e+00> : vector<64x128xf32>
    %10 = tpu.matmul %7, %8, %cst_9 {dimension_numbers = #tpu.dot_dimension_numbers<[1], [0], [0], [1], [0, 0, 1, 1], [], []>} : vector<64x128xf32>, vector<128x128xf32>, vector<64x128xf32> -> vector<64x128xf32>
    %11 = vector.broadcast %9 : vector<1x128xf32> to vector<64x128xf32>
    %12 = arith.addf %10, %11 : vector<64x128xf32>
    %cst_10 = arith.constant 0.000000e+00 : f32
    %13 = vector.broadcast %cst_10 : f32 to vector<64x128xf32>
    %14 = arith.maximumf %12, %13 : vector<64x128xf32>
    %c0_11 = arith.constant 0 : index
    %c0_12 = arith.constant 0 : index
    %15 = vector.load %arg7[%c0_11, %c0_12] : memref<64x256xf32, #tpu.memory_space<vmem>>, vector<64x128xf32>
    tpu.vector_store %arg7[%c0_11, %c0_12], %14 {strides = array<i32>} : memref<64x256xf32, #tpu.memory_space<vmem>>, vector<64x128xf32>,
    %c0_13 = arith.constant 0 : index
    %c0_14 = arith.constant 0 : index
    %16 = vector.load %arg4[%c0_13, %c0_14] : memref<128x128xf32, #tpu.memory_space<vmem>>, vector<128x128xf32>
    %c2 = arith.constant 2 : index
    %c0_15 = arith.constant 0 : index
    %17 = vector.load %arg6[%c2, %c0_15] : memref<4x128xf32, #tpu.memory_space<vmem>>, vector<1x128xf32>
    %cst_16 = arith.constant dense<0.000000e+00> : vector<64x128xf32>
    %18 = tpu.matmul %14, %16, %cst_16 {dimension_numbers = #tpu.dot_dimension_numbers<[1], [0], [0], [1], [0, 0, 1, 1], [], []>} : vector<64x128xf32>, vector<128x128xf32>, vector<64x128xf32> -> vector<64x128xf32>
    %19 = vector.broadcast %17 : vector<1x128xf32> to vector<64x128xf32>
    %20 = arith.addf %18, %19 : vector<64x128xf32>
    %cst_17 = arith.constant 0.000000e+00 : f32
    %21 = vector.broadcast %cst_17 : f32 to vector<64x128xf32>
    %22 = arith.maximumf %20, %21 : vector<64x128xf32>
    %c0_18 = arith.constant 0 : index
    %c0_19 = arith.constant 0 : index
    %23 = vector.load %arg5[%c0_18, %c0_19] : memref<128x128xf32, #tpu.memory_space<vmem>>, vector<128x128xf32>
    %c3 = arith.constant 3 : index
    %c0_20 = arith.constant 0 : index
    %24 = vector.load %arg6[%c3, %c0_20] : memref<4x128xf32, #tpu.memory_space<vmem>>, vector<1x128xf32>
    %cst_21 = arith.constant dense<0.000000e+00> : vector<64x128xf32>
    %25 = tpu.matmul %22, %23, %cst_21 {dimension_numbers = #tpu.dot_dimension_numbers<[1], [0], [0], [1], [0, 0, 1, 1], [], []>} : vector<64x128xf32>, vector<128x128xf32>, vector<64x128xf32> -> vector<64x128xf32>
    %26 = vector.broadcast %24 : vector<1x128xf32> to vector<64x128xf32>
    %27 = arith.addf %25, %26 : vector<64x128xf32>
    %28 = arith.negf %27 : vector<64x128xf32>
    %29 = math.exp %28 : vector<64x128xf32>
    %cst_22 = arith.constant 1.000000e+00 : f32
    %30 = vector.broadcast %cst_22 : f32 to vector<64x128xf32>
    %31 = arith.addf %30, %29 : vector<64x128xf32>
    %32 = arith.divf %30, %31 : vector<64x128xf32>
    %c0_23 = arith.constant 0 : index
    %c128 = arith.constant 128 : index
    %33 = vector.load %arg7[%c0_23, %c128] : memref<64x256xf32, #tpu.memory_space<vmem>>, vector<64x128xf32>
    tpu.vector_store %arg7[%c0_23, %c128], %32 {strides = array<i32>} : memref<64x256xf32, #tpu.memory_space<vmem>>, vector<64x128xf32>,
    return
  }
  func.func @transform_0(%arg0: i32) -> (i32, i32) {
    %c0_i32 = arith.constant 0 : i32
    %c0_i32_0 = arith.constant 0 : i32
    return %arg0, %c0_i32 : i32, i32
  }
  func.func @transform_1(%arg0: i32) -> (i32, i32) {
    %c0_i32 = arith.constant 0 : i32
    %c0_i32_0 = arith.constant 0 : i32
    %c0_i32_1 = arith.constant 0 : i32
    return %c0_i32, %c0_i32_0 : i32, i32
  }
  func.func @transform_2(%arg0: i32) -> (i32, i32) {
    %c0_i32 = arith.constant 0 : i32
    %c0_i32_0 = arith.constant 0 : i32
    %c0_i32_1 = arith.constant 0 : i32
    return %c0_i32, %c0_i32_0 : i32, i32
  }
  func.func @transform_3(%arg0: i32) -> (i32, i32) {
    %c0_i32 = arith.constant 0 : i32
    %c0_i32_0 = arith.constant 0 : i32
    %c0_i32_1 = arith.constant 0 : i32
    return %c0_i32, %c0_i32_0 : i32, i32
  }
  func.func @transform_4(%arg0: i32) -> (i32, i32) {
    %c0_i32 = arith.constant 0 : i32
    %c0_i32_0 = arith.constant 0 : i32
    %c0_i32_1 = arith.constant 0 : i32
    return %c0_i32, %c0_i32_0 : i32, i32
  }
  func.func @transform_5(%arg0: i32) -> (i32, i32) {
    %c0_i32 = arith.constant 0 : i32
    %c0_i32_0 = arith.constant 0 : i32
    %c0_i32_1 = arith.constant 0 : i32
    return %c0_i32, %c0_i32_0 : i32, i32
  }
  func.func @transform_6(%arg0: i32) -> (i32, i32) {
    %c0_i32 = arith.constant 0 : i32
    %c0_i32_0 = arith.constant 0 : i32
    return %arg0, %c0_i32 : i32, i32
  }
}

</mosaic_0001>

<bundles_post_ra>
// kernel: autoencoder_forward.1
= control target key start
LH: loop header
LB: loop body
LE: loop exit
PB: predicated region body
PF: predicated region fallthrough
CT: control target
= control target key end

     0   :  { %vm44_vm0 = vcmask 523264   ;;  %s1351_s1 = inlined_call_operand.vmem [shape: f32[64,128], index: 1, kind: input, shape index: {}]   ;;  %s1352_s0 = inlined_call_operand.vmem [shape: f32[64,64], index: 0, kind: input, shape index: {}]   ;;  %s1353_s2 = inlined_call_operand.vmem [shape: f32[128,128], index: 2, kind: input, shape index: {}]   ;;  %s1354_s3 = inlined_call_operand.vmem [shape: f32[128,128], index: 3, kind: input, shape index: {}]   ;;  %s1355_s5 = inlined_call_operand.vmem [shape: f32[4,128], index: 5, kind: input, shape index: {}]   ;;  %s1356_s4 = inlined_call_operand.vmem [shape: f32[128,128], index: 4, kind: input, shape index: {}]   ;;  %s1357_s6 = inlined_call_operand.vmem [shape: f32[64,256], index: 6, kind: output, shape index: {}]  }
   0x1   :  { %v31_v0 = vld [vmem:[%s1351_s1] sm:$0xff]  ;;  %v32_v1 = vld [vmem:[%s1351_s1 + $0x8] sm:$0xff]  ;;  %v33_v2 = vld [vmem:[%s1351_s1 + $0x10] sm:$0xff] }
   0x2   :  { %v912_v3 = vpack.c.bf16 %v32_v1, %v31_v0  ;;  %v34_v4 = vld [vmem:[%s1351_s1 + $0x18] sm:$0xff]  ;;  %v35_v6 = vld [vmem:[%s1351_s1 + $0x20] sm:$0xff]  ;;  %v36_v7 = vld [vmem:[%s1351_s1 + $0x28] sm:$0xff] }
   0x3   :  { %v916_v5 = vpack.c.bf16 %v34_v4, %v33_v2  ;;  %v23_v8 = vld [vmem:[%s1352_s0] sm:$0xff]  ;;  %v920_v9 = vpack.c.bf16 %v36_v7, %v35_v6  ;;  %v37_v10 = vld [vmem:[%s1351_s1 + $0x30] sm:$0xff]  ;;  %v183_v12 = vld [vmem:[%s1353_s2 + $0x8] sm:$0xff] }
   0x4   :  { %913 = vmatprep.subr.bf16.mxu0 %v912_v3  ;;  %768 = vmatprep.mubr.msk.f32.mxu0 %vm44_vm0, %v23_v8  ;;  %v182_v11 = vld [vmem:[%s1353_s2] sm:$0xff]  ;;  %v38_v13 = vld [vmem:[%s1351_s1 + $0x38] sm:$0xff]  ;;  %v184_v15 = vld [vmem:[%s1353_s2 + $0x10] sm:$0xff] }
   0x5   :  { %915 = vmatpush3.bf16.msra.mxu0 %v912_v3  ;;  %v928_v14 = vpack.c.bf16 %v183_v12, %v182_v11  ;;  %v185_v16 = vld [vmem:[%s1353_s2 + $0x18] sm:$0xff]  ;;  %v186_v18 = vld [vmem:[%s1353_s2 + $0x20] sm:$0xff]  ;;  %v187_v19 = vld [vmem:[%s1353_s2 + $0x28] sm:$0xff]  ;;  %v924_v20 = vpack.c.bf16 %v38_v13, %v37_v10 }
   0x6   :  { %917 = vmatprep.subr.bf16.mxu0 %v916_v5  ;;  %v932_v17 = vpack.c.bf16 %v185_v16, %v184_v15  ;;  %v936_v21 = vpack.c.bf16 %v187_v19, %v186_v18  ;;  %v188_v22 = vld [vmem:[%s1353_s2 + $0x30] sm:$0xff]  ;;  %v189_v23 = vld [vmem:[%s1353_s2 + $0x38] sm:$0xff]  ;;  %v190_v25 = vld [vmem:[%s1353_s2 + $0x40] sm:$0xff] }
   0x7   :  { %929 = vmatprep.subr.bf16.mxu1 %v928_v14  ;;  %v940_v24 = vpack.c.bf16 %v189_v23, %v188_v22  ;;  %v191_v26 = vld [vmem:[%s1353_s2 + $0x48] sm:$0xff]  ;;  %v25_v28 = vld [vmem:[%s1352_s0 + $0x10] sm:$0xff]  ;;  %v193_v31 = vld [vmem:[%s1353_s2 + $0x58] sm:$0xff] }
   0x8   :  { %931 = vmatpush3.bf16.msra.mxu1 %v928_v14  ;;  %v24_v27 = vld [vmem:[%s1352_s0 + $0x8] sm:$0xff]  ;;  %v944_v29 = vpack.c.bf16 %v191_v26, %v190_v25  ;;  %v192_v30 = vld [vmem:[%s1353_s2 + $0x50] sm:$0xff]  ;;  %v26_v32 = vld [vmem:[%s1352_s0 + $0x18] sm:$0xff] }
   0x9   :  { %919 = vmatpush3.bf16.msra.mxu0 %v916_v5  ;;  %933 = vmatprep.subr.bf16.mxu1 %v932_v17  ;;  %v27_v33 = vld [vmem:[%s1352_s0 + $0x20] sm:$0xff]  ;;  %v948_v34 = vpack.c.bf16 %v193_v31, %v192_v30  ;;  %v195_v36 = vld [vmem:[%s1353_s2 + $0x68] sm:$0xff]  ;;  %v29_v38 = vld [vmem:[%s1352_s0 + $0x30] sm:$0xff] }
   0xa   :  { %921 = vmatprep.subr.bf16.mxu0 %v920_v9  ;;  %v194_v35 = vld [vmem:[%s1353_s2 + $0x60] sm:$0xff]  ;;  %v28_v37 = vld [vmem:[%s1352_s0 + $0x28] sm:$0xff]  ;;  %v30_v40 = vld [vmem:[%s1352_s0 + $0x38] sm:$0xff] }
   0xb   :  { %v952_v39 = vpack.c.bf16 %v195_v36, %v194_v35  ;;  %v196_v41 = vld [vmem:[%s1353_s2 + $0x70] sm:$0xff]  ;;  %v197_v42 = vld [vmem:[%s1353_s2 + $0x78] sm:$0xff]  ;;  %v324_v44 = vld [vmem:[%s1354_s3] sm:$0xff] }
   0xc   :  { %935 = vmatpush3.bf16.msra.mxu1 %v932_v17  ;;  %v956_v43 = vpack.c.bf16 %v197_v42, %v196_v41  ;;  %v325_v45 = vld [vmem:[%s1354_s3 + $0x8] sm:$0xff]  ;;  %v326_v46 = vld [vmem:[%s1354_s3 + $0x10] sm:$0xff]  ;;  %v327_v48 = vld [vmem:[%s1354_s3 + $0x18] sm:$0xff] }
   0xd   :  { %923 = vmatpush3.bf16.msra.mxu0 %v920_v9  ;;  %937 = vmatprep.subr.bf16.mxu1 %v936_v21  ;;  %v960_v47 = vpack.c.bf16 %v325_v45, %v324_v44  ;;  %v964_v49 = vpack.c.bf16 %v327_v48, %v326_v46  ;;  %v328_v50 = vld [vmem:[%s1354_s3 + $0x20] sm:$0xff]  ;;  %v329_v51 = vld [vmem:[%s1354_s3 + $0x28] sm:$0xff]  ;;  %v330_v53 = vld [vmem:[%s1354_s3 + $0x30] sm:$0xff] }
   0xe   :  { %925 = vmatprep.subr.bf16.mxu0 %v924_v20  ;;  %v968_v52 = vpack.c.bf16 %v329_v51, %v328_v50  ;;  %v331_v54 = vld [vmem:[%s1354_s3 + $0x38] sm:$0xff]  ;;  %v332_v56 = vld [vmem:[%s1354_s3 + $0x40] sm:$0xff]  ;;  %v333_v57 = vld [vmem:[%s1354_s3 + $0x48] sm:$0xff] }
   0xf   :  { %v972_v55 = vpack.c.bf16 %v331_v54, %v330_v53  ;;  %v976_v58 = vpack.c.bf16 %v333_v57, %v332_v56  ;;  %v334_v59 = vld [vmem:[%s1354_s3 + $0x50] sm:$0xff]  ;;  %v335_v60 = vld [vmem:[%s1354_s3 + $0x58] sm:$0xff]  ;;  %v336_v62 = vld [vmem:[%s1354_s3 + $0x60] sm:$0xff] }
  0x10   :  { %939 = vmatpush3.bf16.msra.mxu1 %v936_v21  ;;  %v980_v61 = vpack.c.bf16 %v335_v60, %v334_v59  ;;  %v337_v63 = vld [vmem:[%s1354_s3 + $0x68] sm:$0xff]  ;;  %v644_v1 = vld [vmem:[%s1355_s5] ss:$0 sm:$0xff]  ;;  %v338_v26 = vld [vmem:[%s1354_s3 + $0x70] sm:$0xff] }
  0x11   :  { %927 = vmatpush3.bf16.msra.mxu0 %v924_v20  ;;  %941 = vmatprep.subr.bf16.mxu1 %v940_v24  ;;  %v984_v0 = vpack.c.bf16 %v337_v63, %v336_v62  ;;  %v459_v30 = vld [vmem:[%s1356_s4 + $0x8] sm:$0xff]  ;;  %v460_v31 = vld [vmem:[%s1356_s4 + $0x10] sm:$0xff]  ;;  %v462_v35 = vld [vmem:[%s1356_s4 + $0x20] sm:$0xff] }
  0x12   :  { %961 = vmatprep.subr.bf16.mxu0 %v960_v47  ;;  %v463_v36 = vld [vmem:[%s1356_s4 + $0x28] sm:$0xff]  ;;  %v466_v41 = vld [vmem:[%s1356_s4 + $0x40] sm:$0xff]  ;;  %v468_v44 = vld [vmem:[%s1356_s4 + $0x50] sm:$0xff] }
  0x13   :  { %v467_v42 = vld [vmem:[%s1356_s4 + $0x48] sm:$0xff]  ;;  %v469_v45 = vld [vmem:[%s1356_s4 + $0x58] sm:$0xff]  ;;  %v653_v50 = vld [vmem:[%s1355_s5 + $0x1] ss:$0 sm:$0xff] }
  0x14   :  { %769 = vmatmul.mubr.msk.f32.vlgmr.msra.gmra.mrb[0].mxu0 %vm44_vm0, %v24_v27  ;;  %943 = vmatpush3.bf16.msra.mxu1 %v940_v24  ;;  %v339_v27 = vld [vmem:[%s1354_s3 + $0x78] sm:$0xff]  ;;  %v1012_v46 = vpack.c.bf16 %v469_v45, %v468_v44  ;;  %v471_v48 = vld [vmem:[%s1356_s4 + $0x68] sm:$0xff] }
  0x15   :  { %771 = vmatprep.mubr.msk.f32.mxu0 %vm44_vm0, %v25_v28  ;;  %945 = vmatprep.subr.bf16.mxu1 %v944_v29  ;;  %v988_v28 = vpack.c.bf16 %v339_v27, %v338_v26 }
  0x16   :  { %963 = vmatpush3.bf16.msra.mxu0 %v960_v47  ;;  %v470_v47 = vld [vmem:[%s1356_s4 + $0x60] sm:$0xff] }
  0x17   :  { %965 = vmatprep.subr.bf16.mxu0 %v964_v49 }
  0x18   :  { %772 = vmatmul.mubr.msk.f32.gmra.mrb[2].mxu0 %vm44_vm0, %v26_v32  ;;  %947 = vmatpush3.bf16.msra.mxu1 %v944_v29  ;;  %v458_v29 = vld [vmem:[%s1356_s4] sm:$0xff] }
  0x19   :  { %774 = vmatprep.mubr.msk.f32.mxu0 %vm44_vm0, %v27_v33  ;;  %949 = vmatprep.subr.bf16.mxu1 %v948_v34  ;;  %v992_v32 = vpack.c.bf16 %v459_v30, %v458_v29  ;;  %v461_v33 = vld [vmem:[%s1356_s4 + $0x18] sm:$0xff] }
  0x1a   :  { %967 = vmatpush3.bf16.msra.mxu0 %v964_v49  ;;  %v1016_v49 = vpack.c.bf16 %v471_v48, %v470_v47 }
  0x1b   :  { %969 = vmatprep.subr.bf16.mxu0 %v968_v52 }
  0x1c   :  { %775 = vmatmul.mubr.msk.f32.gmra.mrb[4].mxu0 %vm44_vm0, %v28_v37  ;;  %951 = vmatpush3.bf16.msra.mxu1 %v948_v34  ;;  %v996_v34 = vpack.c.bf16 %v461_v33, %v460_v31  ;;  %v1000_v37 = vpack.c.bf16 %v463_v36, %v462_v35 }
  0x1d   :  { %777 = vmatprep.mubr.msk.f32.mxu0 %vm44_vm0, %v29_v38  ;;  %953 = vmatprep.subr.bf16.mxu1 %v952_v39  ;;  %v464_v38 = vld [vmem:[%s1356_s4 + $0x30] sm:$0xff] }
  0x1e   :  { %971 = vmatpush3.bf16.msra.mxu0 %v968_v52 }
  0x1f   :  { %973 = vmatprep.subr.bf16.mxu0 %v972_v55 }
  0x20   :  { %778 = vmatmul.mubr.msk.f32.gmra.mrb[6].mxu0 %vm44_vm0, %v30_v40  ;;  %955 = vmatpush3.bf16.msra.mxu1 %v952_v39  ;;  %v465_v39 = vld [vmem:[%s1356_s4 + $0x38] sm:$0xff] }
  0x21   :  { %957 = vmatprep.subr.bf16.mxu1 %v956_v43  ;;  %v1004_v40 = vpack.c.bf16 %v465_v39, %v464_v38  ;;  %v655_v39 = vld [vmem:[%s1355_s5 + $0x3] ss:$0 sm:$0xff] }
  0x22   :  { %975 = vmatpush3.bf16.msra.mxu0 %v972_v55 }
  0x23   :  { %977 = vmatprep.subr.bf16.mxu0 %v976_v58 }
  0x24   :  { %959 = vmatpush3.bf16.msra.mxu1 %v956_v43  ;;  %v1008_v43 = vpack.c.bf16 %v467_v42, %v466_v41 }
  0x25   :  { %993 = vmatprep.subr.bf16.mxu1 %v992_v32 }
  0x26   :  { %979 = vmatpush3.bf16.msra.mxu0 %v976_v58 }
  0x27   :  { %981 = vmatprep.subr.bf16.mxu0 %v980_v61 }
  0x2a   :  { %983 = vmatpush3.bf16.msra.mxu0 %v980_v61 }
  0x2b   :  { %985 = vmatprep.subr.bf16.mxu0 %v984_v0 }
  0x2e   :  { %987 = vmatpush3.bf16.msra.mxu0 %v984_v0 }
  0x2f   :  { %989 = vmatprep.subr.bf16.mxu0 %v988_v28 }
  0x32   :  { %991 = vmatpush3.bf16.msra.mxu0 %v988_v28 }
  0xe7   :  { %v770_v2 = vpop.f32.mrb[0].mxu0 }
  0xe8   :  { %v141_v3 = vadd.f32 %v770_v2, %v644_v1  ;;  %v135_v4 = vpop.f32.mrb[1].mxu0 }
  0xe9   :  { %v136_v5 = vadd.f32 %v644_v1, %v135_v4 }
  0xea   :  { %v175_v8 = vmax.f32 %v141_v3, 0.0 }
  0xeb   :  { %v773_v6 = vpop.f32.mrb[2].mxu0  ;;  %v174_v7 = vmax.f32 %v136_v5, 0.0 }
  0xec   :  { %v151_v9 = vadd.f32 %v773_v6, %v644_v1  ;;  %v145_v10 = vpop.f32.mrb[3].mxu0 }
  0xed   :  { %v146_v11 = vadd.f32 %v644_v1, %v145_v10  ;;  %812 = vmatprep.mubr.f32.mxu1 %v174_v7 }
  0xee   :  { %813 = vmatmul.mubr.f32.vlgmr.msra.gmra.mrb[0].mxu1 %v175_v8  ;;  %v177_v14 = vmax.f32 %v151_v9, 0.0 }
  0xef   :  { %v176_v12 = vmax.f32 %v146_v11, 0.0  ;;  %v776_v13 = vpop.f32.mrb[4].mxu0  ;;  %995 = vmatpush3.bf16.msra.mxu1 %v992_v32  ;;  %v472_v11 = vld [vmem:[%s1356_s4 + $0x70] sm:$0xff] }
  0xf0   :  { %v161_v15 = vadd.f32 %v776_v13, %v644_v1  ;;  %v155_v16 = vpop.f32.mrb[5].mxu0  ;;  %997 = vmatprep.subr.bf16.mxu1 %v996_v34 }
  0xf1   :  { %v156_v17 = vadd.f32 %v644_v1, %v155_v16  ;;  %815 = vmatprep.mubr.f32.mxu1 %v176_v12  ;;  %v473_v12 = vld [vmem:[%s1356_s4 + $0x78] sm:$0xff] }
  0xf2   :  { %816 = vmatmul.mubr.f32.gmra.mrb[2].mxu1 %v177_v14  ;;  %v179_v20 = vmax.f32 %v161_v15, 0.0  ;;  %v1020_v13 = vpack.c.bf16 %v473_v12, %v472_v11  ;;  %v654_v14 = vld [vmem:[%s1355_s5 + $0x2] ss:$0 sm:$0xff] }
  0xf3   :  { %v178_v18 = vmax.f32 %v156_v17, 0.0  ;;  %v779_v19 = vpop.f32.mrb[6].mxu0  ;;  %999 = vmatpush3.bf16.msra.mxu1 %v996_v34 }
  0xf4   :  { %v171_v21 = vadd.f32 %v779_v19, %v644_v1  ;;  %v165_v22 = vpop.f32.mrb[7].mxu0  ;;  %1001 = vmatprep.subr.bf16.mxu1 %v1000_v37 }
  0xf5   :  { %v166_v23 = vadd.f32 %v644_v1, %v165_v22  ;;  %818 = vmatprep.mubr.f32.mxu1 %v178_v18 }
  0xf6   :  { %819 = vmatmul.mubr.f32.gmra.mrb[4].mxu1 %v179_v20  ;;  %v181_v25 = vmax.f32 %v171_v21, 0.0 }
  0xf7   :  { %v180_v24 = vmax.f32 %v166_v23, 0.0  ;;  %1003 = vmatpush3.bf16.msra.mxu1 %v1000_v37 }
  0xf8   :  { %1005 = vmatprep.subr.bf16.mxu1 %v1004_v40 }
  0xf9   :  { %821 = vmatprep.mubr.f32.mxu1 %v180_v24 }
  0xfa   :  { %822 = vmatmul.mubr.f32.gmra.mrb[6].mxu1 %v181_v25 }
  0xfb   :  { %1007 = vmatpush3.bf16.msra.mxu1 %v1004_v40 }
  0xfc   :  { %1009 = vmatprep.subr.bf16.mxu1 %v1008_v43 }
  0xff   :  { %1011 = vmatpush3.bf16.msra.mxu1 %v1008_v43 }
 0x100   :  { %1013 = vmatprep.subr.bf16.mxu1 %v1012_v46 }
 0x103   :  { %1015 = vmatpush3.bf16.msra.mxu1 %v1012_v46 }
 0x104   :  { %1017 = vmatprep.subr.bf16.mxu1 %v1016_v49 }
 0x107   :  { %1019 = vmatpush3.bf16.msra.mxu1 %v1016_v49 }
 0x108   :  { %1021 = vmatprep.subr.bf16.mxu1 %v1020_v13 }
 0x10b   :  { %1023 = vmatpush3.bf16.msra.mxu1 %v1020_v13 }
 0x1c1   :  { %v814_v51 = vpop.f32.mrb[0].mxu1 }
 0x1c2   :  { %v275_v52 = vadd.f32 %v814_v51, %v653_v50  ;;  %v269_v53 = vpop.f32.mrb[1].mxu1 }
 0x1c3   :  { %v270_v54 = vadd.f32 %v653_v50, %v269_v53 }
 0x1c4   :  { %v309_v55 = vmax.f32 %v275_v52, 0.0 }
 0x1c5   :  { %v308_v56 = vmax.f32 %v270_v54, 0.0  ;;  %v817_v57 = vpop.f32.mrb[2].mxu1 }
 0x1c6   :  { %317 = vst [vmem:[%s1357_s6 + $0x10] sm:$0xff] %v309_v55  ;;  %v285_v58 = vadd.f32 %v817_v57, %v653_v50  ;;  %v279_v59 = vpop.f32.mrb[3].mxu1 }
 0x1c7   :  { %316 = vst [vmem:[%s1357_s6] sm:$0xff] %v308_v56  ;;  %v280_v60 = vadd.f32 %v653_v50, %v279_v59  ;;  %856 = vmatprep.mubr.f32.mxu0 %v308_v56 }
 0x1c8   :  { %v311_v61 = vmax.f32 %v285_v58, 0.0  ;;  %857 = vmatmul.mubr.f32.vlgmr.msra.gmra.mrb[8].mxu0 %v309_v55 }
 0x1c9   :  { %v310_v62 = vmax.f32 %v280_v60, 0.0  ;;  %v820_v63 = vpop.f32.mrb[4].mxu1 }
 0x1ca   :  { %319 = vst [vmem:[%s1357_s6 + $0x30] sm:$0xff] %v311_v61  ;;  %v295_v0 = vadd.f32 %v820_v63, %v653_v50  ;;  %v289_v1 = vpop.f32.mrb[5].mxu1 }
 0x1cb   :  { %318 = vst [vmem:[%s1357_s6 + $0x20] sm:$0xff] %v310_v62  ;;  %v290_v2 = vadd.f32 %v653_v50, %v289_v1  ;;  %859 = vmatprep.mubr.f32.mxu0 %v310_v62 }
 0x1cc   :  { %v313_v3 = vmax.f32 %v295_v0, 0.0  ;;  %860 = vmatmul.mubr.f32.gmra.mrb[10].mxu0 %v311_v61 }
 0x1cd   :  { %v312_v4 = vmax.f32 %v290_v2, 0.0  ;;  %v823_v5 = vpop.f32.mrb[6].mxu1 }
 0x1ce   :  { %321 = vst [vmem:[%s1357_s6 + $0x50] sm:$0xff] %v313_v3  ;;  %v305_v6 = vadd.f32 %v823_v5, %v653_v50  ;;  %v299_v7 = vpop.f32.mrb[7].mxu1 }
 0x1cf   :  { %320 = vst [vmem:[%s1357_s6 + $0x40] sm:$0xff] %v312_v4  ;;  %v300_v8 = vadd.f32 %v653_v50, %v299_v7  ;;  %862 = vmatprep.mubr.f32.mxu0 %v312_v4 }
 0x1d0   :  { %v315_v9 = vmax.f32 %v305_v6, 0.0  ;;  %863 = vmatmul.mubr.f32.gmra.mrb[12].mxu0 %v313_v3 }
 0x1d1   :  { %v314_v10 = vmax.f32 %v300_v8, 0.0 }
 0x1d2   :  { %323 = vst [vmem:[%s1357_s6 + $0x70] sm:$0xff] %v315_v9 }
 0x1d3   :  { %322 = vst [vmem:[%s1357_s6 + $0x60] sm:$0xff] %v314_v10  ;;  %865 = vmatprep.mubr.f32.mxu0 %v314_v10 }
 0x1d4   :  { %866 = vmatmul.mubr.f32.gmra.mrb[14].mxu0 %v315_v9 }
 0x29b   :  { %v858_v15 = vpop.f32.mrb[8].mxu0 }
 0x29c   :  { %v417_v16 = vadd.f32 %v858_v15, %v654_v14  ;;  %v411_v17 = vpop.f32.mrb[9].mxu0 }
 0x29d   :  { %v412_v18 = vadd.f32 %v654_v14, %v411_v17 }
 0x29e   :  { %v451_v21 = vmax.f32 %v417_v16, 0.0 }
 0x29f   :  { %v450_v19 = vmax.f32 %v412_v18, 0.0  ;;  %v861_v20 = vpop.f32.mrb[10].mxu0 }
 0x2a0   :  { %v427_v22 = vadd.f32 %v861_v20, %v654_v14  ;;  %v421_v23 = vpop.f32.mrb[11].mxu0 }
 0x2a1   :  { %v422_v24 = vadd.f32 %v654_v14, %v421_v23  ;;  %900 = vmatprep.mubr.f32.mxu1 %v450_v19 }
 0x2a2   :  { %901 = vmatmul.mubr.f32.vlgmr.msra.gmra.mrb[8].mxu1 %v451_v21  ;;  %v453_v27 = vmax.f32 %v427_v22, 0.0 }
 0x2a3   :  { %v452_v25 = vmax.f32 %v422_v24, 0.0  ;;  %v864_v26 = vpop.f32.mrb[12].mxu0 }
 0x2a4   :  { %v437_v28 = vadd.f32 %v864_v26, %v654_v14  ;;  %v431_v29 = vpop.f32.mrb[13].mxu0 }
 0x2a5   :  { %v432_v30 = vadd.f32 %v654_v14, %v431_v29  ;;  %903 = vmatprep.mubr.f32.mxu1 %v452_v25 }
 0x2a6   :  { %904 = vmatmul.mubr.f32.gmra.mrb[10].mxu1 %v453_v27  ;;  %v455_v33 = vmax.f32 %v437_v28, 0.0 }
 0x2a7   :  { %v454_v31 = vmax.f32 %v432_v30, 0.0  ;;  %v867_v32 = vpop.f32.mrb[14].mxu0 }
 0x2a8   :  { %v447_v34 = vadd.f32 %v867_v32, %v654_v14  ;;  %v441_v35 = vpop.f32.mrb[15].mxu0 }
 0x2a9   :  { %v442_v36 = vadd.f32 %v654_v14, %v441_v35  ;;  %906 = vmatprep.mubr.f32.mxu1 %v454_v31 }
 0x2aa   :  { %907 = vmatmul.mubr.f32.gmra.mrb[12].mxu1 %v455_v33  ;;  %v457_v38 = vmax.f32 %v447_v34, 0.0 }
 0x2ab   :  { %v456_v37 = vmax.f32 %v442_v36, 0.0 }
 0x2ad   :  { %909 = vmatprep.mubr.f32.mxu1 %v456_v37 }
 0x2ae   :  { %910 = vmatmul.mubr.f32.gmra.mrb[14].mxu1 %v457_v38 }
 0x375   :  { %v902_v40 = vpop.f32.mrb[8].mxu1 }
 0x376   :  { %v551_v41 = vadd.f32 %v902_v40, %v655_v39  ;;  %v545_v42 = vpop.f32.mrb[9].mxu1 }
 0x377   :  { %v546_v43 = vadd.f32 %v655_v39, %v545_v42 }
 0x378   :  { %v657_v44 = vmul.f32 -1.442695, %v551_v41 }
 0x379   :  { %v656_v45 = vmul.f32 -1.442695, %v546_v43  ;;  %v905_v46 = vpop.f32.mrb[10].mxu1 }
 0x37a   :  { %1024 = vpow2.f32 %v657_v44  ;;  %v561_v47 = vadd.f32 %v905_v46, %v655_v39  ;;  %v555_v48 = vpop.f32.mrb[11].mxu1 }
 0x37b   :  { %1026 = vpow2.f32 %v656_v45  ;;  %v556_v49 = vadd.f32 %v655_v39, %v555_v48 }
 0x37c   :  { %v659_v50 = vmul.f32 -1.442695, %v561_v47 }
 0x37d   :  { %v658_v51 = vmul.f32 -1.442695, %v556_v49  ;;  %v908_v52 = vpop.f32.mrb[12].mxu1 }
 0x37e   :  { %1028 = vpow2.f32 %v659_v50  ;;  %v571_v53 = vadd.f32 %v908_v52, %v655_v39  ;;  %v565_v54 = vpop.f32.mrb[13].mxu1 }
 0x37f   :  { %1030 = vpow2.f32 %v658_v51  ;;  %v566_v55 = vadd.f32 %v655_v39, %v565_v54 }
 0x380   :  { %v661_v56 = vmul.f32 -1.442695, %v571_v53 }
 0x381   :  { %v660_v57 = vmul.f32 -1.442695, %v566_v55  ;;  %v911_v58 = vpop.f32.mrb[14].mxu1 }
 0x382   :  { %1032 = vpow2.f32 %v661_v56  ;;  %v581_v59 = vadd.f32 %v911_v58, %v655_v39  ;;  %v575_v60 = vpop.f32.mrb[15].mxu1 }
 0x383   :  { %1034 = vpow2.f32 %v660_v57  ;;  %v576_v61 = vadd.f32 %v655_v39, %v575_v60 }
 0x384   :  { %v1025_v62 = vpop.eup %1024  ;;  %v663_v63 = vmul.f32 -1.442695, %v581_v59 }
 0x385   :  { %v1027_v0 = vpop.eup %1026  ;;  %v609_v1 = vadd.f32 1.0, %v1025_v62  ;;  %v662_v2 = vmul.f32 -1.442695, %v576_v61 }
 0x386   :  { %v608_v3 = vadd.f32 1.0, %v1027_v0  ;;  %1036 = vpow2.f32 %v663_v63 }
 0x387   :  { %1038 = vrcp.f32 %v609_v1 }
 0x388   :  { %v1029_v4 = vpop.eup %1028  ;;  %1040 = vrcp.f32 %v608_v3 }
 0x389   :  { %v1031_v5 = vpop.eup %1030  ;;  %v611_v6 = vadd.f32 1.0, %v1029_v4  ;;  %1042 = vpow2.f32 %v662_v2 }
 0x38a   :  { %v610_v7 = vadd.f32 1.0, %v1031_v5 }
 0x38b   :  { %1044 = vrcp.f32 %v611_v6 }
 0x38c   :  { %v1033_v8 = vpop.eup %1032  ;;  %1046 = vrcp.f32 %v610_v7 }
 0x38d   :  { %v1035_v9 = vpop.eup %1034  ;;  %v613_v10 = vadd.f32 1.0, %v1033_v8 }
 0x38e   :  { %v612_v11 = vadd.f32 1.0, %v1035_v9 }
 0x38f   :  { %1048 = vrcp.f32 %v613_v10 }
 0x390   :  { %v1037_v12 = vpop.eup %1036  ;;  %1050 = vrcp.f32 %v612_v11 }
 0x391   :  { %v1039_v13 = vpop.eup %1038  ;;  %v615_v14 = vadd.f32 1.0, %v1037_v12 }
 0x392   :  { %v1041_v15 = vpop.eup %1040  ;;  %633 = vst [vmem:[%s1357_s6 + $0x18] sm:$0xff] %v1039_v13 }
 0x393   :  { %v1043_v16 = vpop.eup %1042  ;;  %632 = vst [vmem:[%s1357_s6 + $0x8] sm:$0xff] %v1041_v15  ;;  %1052 = vrcp.f32 %v615_v14 }
 0x394   :  { %v614_v17 = vadd.f32 1.0, %v1043_v16 }
 0x395   :  { %v1045_v18 = vpop.eup %1044 }
 0x396   :  { %v1047_v19 = vpop.eup %1046  ;;  %635 = vst [vmem:[%s1357_s6 + $0x38] sm:$0xff] %v1045_v18  ;;  %1054 = vrcp.f32 %v614_v17 }
 0x397   :  { %634 = vst [vmem:[%s1357_s6 + $0x28] sm:$0xff] %v1047_v19 }
 0x399   :  { %v1049_v20 = vpop.eup %1048 }
 0x39a   :  { %v1051_v21 = vpop.eup %1050  ;;  %637 = vst [vmem:[%s1357_s6 + $0x58] sm:$0xff] %v1049_v20 }
 0x39b   :  { %636 = vst [vmem:[%s1357_s6 + $0x48] sm:$0xff] %v1051_v21 }
 0x39d   :  { %v1053_v22 = vpop.eup %1052 }
 0x39e   :  { %639 = vst [vmem:[%s1357_s6 + $0x78] sm:$0xff] %v1053_v22 }
 0x3a0   :  { %v1055_v23 = vpop.eup %1054 }
 0x3a1   :  { %638 = vst [vmem:[%s1357_s6 + $0x68] sm:$0xff] %v1055_v23 }

</bundles_post_ra>
